<compile_context>
chip_gen: v5e
topology: v5e:2x2
jax: 0.10.0
libtpu: 0.0.40
codegen_flags: <defaults>
</compile_context>

<pallas_src>
import jax
import jax.numpy as jnp
from jax.experimental import pallas as pl
from jax.experimental.pallas import tpu as pltpu


# ----------------------------- in-kernel math helpers -----------------------------

def _erf_poly(z):
    """erf(z) via Abramowitz & Stegun 7.1.26 (max abs error ~1.5e-7, i.e. f32-exact)."""
    a1, a2, a3, a4, a5 = 0.254829592, -0.284496736, 1.421413741, -1.453152027, 1.061405429
    p = 0.3275911
    sgn = jnp.where(z >= 0.0, 1.0, -1.0)
    az = jnp.abs(z)
    t = 1.0 / (1.0 + p * az)
    poly = ((((a5 * t + a4) * t + a3) * t + a2) * t + a1) * t
    y = 1.0 - poly * jnp.exp(-az * az)
    return sgn * y


def _gelu_exact(x):
    """Exact GELU: 0.5 * x * (1 + erf(x / sqrt(2))) — matches torch.nn.GELU() default."""
    return 0.5 * x * (1.0 + _erf_poly(x * 0.7071067811865475))


# ----------------------------------- kernel ---------------------------------------

def _ff_kernel(x_ref, w1_ref, b1_ref, w2_ref, b2_ref, o_ref):
    # x_ref: (block_m, dim)   w1_ref: (dim, hidden)   b1_ref: (1, hidden)
    # w2_ref: (hidden, dim)   b2_ref: (1, dim)        o_ref: (block_m, dim)
    x = x_ref[...]

    # Linear 1 (MXU, f32 accumulation) + bias
    h = jnp.dot(x, w1_ref[...], preferred_element_type=jnp.float32) + b1_ref[...]

    # GELU (exact) in f32 on VPU/EUP
    h = _gelu_exact(h)

    # Dropout(p=0.0) is the identity.

    # Linear 2 (MXU, f32 accumulation) + bias
    h = h.astype(w2_ref.dtype)
    out = jnp.dot(h, w2_ref[...], preferred_element_type=jnp.float32) + b2_ref[...]

    o_ref[...] = out.astype(o_ref.dtype)


# ----------------------------------- wrapper --------------------------------------

def feedforward_pallas(x, w1, b1, w2, b2, *, block_m=None, compute_dtype=None):
    """FeedForward forward pass.

    x:  (B, N, dim)
    w1: (dim, hidden)   b1: (1, hidden)      (PyTorch Linear weights pre-transposed to (in, out))
    w2: (hidden, dim)   b2: (1, dim)
    compute_dtype: optional (e.g. jnp.bfloat16) — cast x/w1/w2 at the boundary; accumulation
                   stays f32 via preferred_element_type.
    """
    B, N, dim = x.shape
    hidden = w1.shape[1]
    assert w1.shape == (dim, hidden)
    assert b1.shape == (1, hidden)
    assert w2.shape == (hidden, dim)
    assert b2.shape == (1, dim)

    out_dtype = x.dtype
    M = B * N
    x2 = x.reshape(M, dim)                      # fold batch into the matmul M dimension

    if compute_dtype is not None:
        x2 = x2.astype(compute_dtype)
        w1 = w1.astype(compute_dtype)
        w2 = w2.astype(compute_dtype)
        # biases stay f32 and are added to the f32 accumulator

    # Coarse row-block grid: one step at toy sizes; multiple "parallel" steps for large B*N.
    if block_m is None:
        block_m = M if M <= 512 else 512
    n_blocks = pl.cdiv(M, block_m)
    M_pad = n_blocks * block_m
    if M_pad != M:
        x2 = jnp.pad(x2, ((0, M_pad - M), (0, 0)))

    out2 = pl.pallas_call(
        _ff_kernel,
        out_shape=jax.ShapeDtypeStruct((M_pad, dim), out_dtype),
        grid=(n_blocks,),
        in_specs=[
            pl.BlockSpec((block_m, dim), lambda i: (i, 0)),   # activations: tiled over rows
            pl.BlockSpec((dim, hidden), lambda i: (0, 0)),    # weights/biases: resident, same
            pl.BlockSpec((1, hidden), lambda i: (0, 0)),      # block every step
            pl.BlockSpec((hidden, dim), lambda i: (0, 0)),
            pl.BlockSpec((1, dim), lambda i: (0, 0)),
        ],
        out_specs=pl.BlockSpec((block_m, dim), lambda i: (i, 0)),
        compiler_params=pltpu.CompilerParams(
            dimension_semantics=("parallel",)),
    )(x2, w1, b1, w2, b2)

    return out2[:M].reshape(B, N, dim)


# ------------------------------- pure-JAX reference --------------------------------

def feedforward_reference(x, w1, b1, w2, b2):
    h = x @ w1 + b1
    h = jax.nn.gelu(h, approximate=False)       # exact GELU, as in torch.nn.GELU()
    return h @ w2 + b2                          # dropout(p=0) is identity


# -------------------------------------- main ---------------------------------------

if __name__ == "__main__":
    # Small shapes consistent with the module; dim=128 keeps the output store lane-dense.
    B, N, DIM, HIDDEN = 2, 8, 128, 256

    key = jax.random.PRNGKey(0)
    kx, k1, kb1, k2, kb2 = jax.random.split(key, 5)

    x = jax.random.normal(kx, (B, N, DIM), dtype=jnp.float32)
    # Deterministic synthetic parameters (nn.Linear-style scale), stored as (in, out).
    w1 = jax.random.normal(k1, (DIM, HIDDEN), dtype=jnp.float32) * (DIM ** -0.5)
    b1 = jax.random.normal(kb1, (1, HIDDEN), dtype=jnp.float32) * 0.01
    w2 = jax.random.normal(k2, (HIDDEN, DIM), dtype=jnp.float32) * (HIDDEN ** -0.5)
    b2 = jax.random.normal(kb2, (1, DIM), dtype=jnp.float32) * 0.01

    ref = feedforward_reference(x, w1, b1, w2, b2)

    # f32 path
    out = feedforward_pallas(x, w1, b1, w2, b2)
    out = jax.block_until_ready(out)
    assert out.shape == (B, N, DIM)
    assert jnp.allclose(out, ref, atol=1e-3, rtol=1e-3), (
        f"f32 mismatch, max abs err={jnp.max(jnp.abs(out - ref))}")

    # bf16 compute path (v6e/v7x MXU throughput / halved weight DMA), f32 accumulation.
    out_bf16 = feedforward_pallas(x, w1, b1, w2, b2, compute_dtype=jnp.bfloat16)
    out_bf16 = jax.block_until_ready(out_bf16)
    assert jnp.allclose(out_bf16, ref, atol=5e-2, rtol=5e-2), (
        f"bf16 mismatch, max abs err={jnp.max(jnp.abs(out_bf16 - ref))}")

    print("KERNEL_OK")
</pallas_src>

<mosaic_0001>
module attributes {stable_mosaic.version = 11 : i64} {
  func.func @_ff_kernel(%arg0: i32, %arg1: memref<16x128xf32, #tpu.memory_space<vmem>>, %arg2: memref<128x256xf32, #tpu.memory_space<vmem>>, %arg3: memref<1x256xf32, #tpu.memory_space<vmem>>, %arg4: memref<256x128xf32, #tpu.memory_space<vmem>>, %arg5: memref<1x128xf32, #tpu.memory_space<vmem>>, %arg6: memref<16x128xf32, #tpu.memory_space<vmem>>) attributes {dimension_semantics = [#tpu.dimension_semantics<parallel>], iteration_bounds = array<i64: 1>, scalar_prefetch = 0 : i64, scratch_operands = 0 : i64, tpu.core_type = #tpu.core_type<tc>, window_params = [{transform_indices = @transform_0, window_bounds = array<i64: 16, 128>}, {pipeline_mode = #tpu.pipeline_mode<synchronous>, transform_indices = @transform_1, window_bounds = array<i64: 128, 256>}, {pipeline_mode = #tpu.pipeline_mode<synchronous>, transform_indices = @transform_2, window_bounds = array<i64: 1, 256>}, {pipeline_mode = #tpu.pipeline_mode<synchronous>, transform_indices = @transform_3, window_bounds = array<i64: 256, 128>}, {pipeline_mode = #tpu.pipeline_mode<synchronous>, transform_indices = @transform_4, window_bounds = array<i64: 1, 128>}, {transform_indices = @transform_5, window_bounds = array<i64: 16, 128>}]} {
    %c0 = arith.constant 0 : index
    %c0_0 = arith.constant 0 : index
    %0 = vector.load %arg1[%c0, %c0_0] : memref<16x128xf32, #tpu.memory_space<vmem>>, vector<16x128xf32>
    %c0_1 = arith.constant 0 : index
    %c0_2 = arith.constant 0 : index
    %1 = vector.load %arg2[%c0_1, %c0_2] : memref<128x256xf32, #tpu.memory_space<vmem>>, vector<128x256xf32>
    %cst = arith.constant dense<0.000000e+00> : vector<16x256xf32>
    %2 = tpu.matmul %0, %1, %cst {dimension_numbers = #tpu.dot_dimension_numbers<[1], [0], [0], [1], [0, 0, 1, 1], [], []>} : vector<16x128xf32>, vector<128x256xf32>, vector<16x256xf32> -> vector<16x256xf32>
    %c0_3 = arith.constant 0 : index
    %c0_4 = arith.constant 0 : index
    %3 = vector.load %arg3[%c0_3, %c0_4] : memref<1x256xf32, #tpu.memory_space<vmem>>, vector<1x256xf32>
    %4 = vector.broadcast %3 : vector<1x256xf32> to vector<16x256xf32>
    %5 = arith.addf %2, %4 : vector<16x256xf32>
    %cst_5 = arith.constant 5.000000e-01 : f32
    %6 = vector.broadcast %cst_5 : f32 to vector<16x256xf32>
    %7 = arith.mulf %6, %5 : vector<16x256xf32>
    %cst_6 = arith.constant 0.707106769 : f32
    %8 = vector.broadcast %cst_6 : f32 to vector<16x256xf32>
    %9 = arith.mulf %5, %8 : vector<16x256xf32>
    %cst_7 = arith.constant 0.000000e+00 : f32
    %10 = vector.broadcast %cst_7 : f32 to vector<16x256xf32>
    %11 = arith.cmpf oge, %9, %10 : vector<16x256xf32>
    %cst_8 = arith.constant 1.000000e+00 : f32
    %cst_9 = arith.constant -1.000000e+00 : f32
    %12 = vector.broadcast %cst_8 : f32 to vector<16x256xf32>
    %13 = vector.broadcast %cst_9 : f32 to vector<16x256xf32>
    %14 = arith.select %11, %12, %13 : vector<16x256xi1>, vector<16x256xf32>
    %15 = math.absf %9 : vector<16x256xf32>
    %cst_10 = arith.constant 0.327591091 : f32
    %16 = vector.broadcast %cst_10 : f32 to vector<16x256xf32>
    %17 = arith.mulf %16, %15 : vector<16x256xf32>
    %cst_11 = arith.constant 1.000000e+00 : f32
    %18 = vector.broadcast %cst_11 : f32 to vector<16x256xf32>
    %19 = arith.addf %18, %17 : vector<16x256xf32>
    %cst_12 = arith.constant 1.000000e+00 : f32
    %20 = vector.broadcast %cst_12 : f32 to vector<16x256xf32>
    %21 = arith.divf %20, %19 : vector<16x256xf32>
    %cst_13 = arith.constant 1.06140542 : f32
    %22 = vector.broadcast %cst_13 : f32 to vector<16x256xf32>
    %23 = arith.mulf %22, %21 : vector<16x256xf32>
    %cst_14 = arith.constant -1.45315206 : f32
    %24 = vector.broadcast %cst_14 : f32 to vector<16x256xf32>
    %25 = arith.addf %23, %24 : vector<16x256xf32>
    %26 = arith.mulf %25, %21 : vector<16x256xf32>
    %cst_15 = arith.constant 1.42141378 : f32
    %27 = vector.broadcast %cst_15 : f32 to vector<16x256xf32>
    %28 = arith.addf %26, %27 : vector<16x256xf32>
    %29 = arith.mulf %28, %21 : vector<16x256xf32>
    %cst_16 = arith.constant -0.284496725 : f32
    %30 = vector.broadcast %cst_16 : f32 to vector<16x256xf32>
    %31 = arith.addf %29, %30 : vector<16x256xf32>
    %32 = arith.mulf %31, %21 : vector<16x256xf32>
    %cst_17 = arith.constant 0.254829586 : f32
    %33 = vector.broadcast %cst_17 : f32 to vector<16x256xf32>
    %34 = arith.addf %32, %33 : vector<16x256xf32>
    %35 = arith.mulf %34, %21 : vector<16x256xf32>
    %cst_18 = arith.constant 0.000000e+00 : f32
    %36 = vector.broadcast %cst_18 : f32 to vector<16x256xf32>
    %37 = arith.subf %36, %15 : vector<16x256xf32>
    %38 = arith.mulf %37, %15 : vector<16x256xf32>
    %39 = math.exp %38 : vector<16x256xf32>
    %40 = arith.mulf %35, %39 : vector<16x256xf32>
    %cst_19 = arith.constant 1.000000e+00 : f32
    %41 = vector.broadcast %cst_19 : f32 to vector<16x256xf32>
    %42 = arith.subf %41, %40 : vector<16x256xf32>
    %43 = arith.mulf %14, %42 : vector<16x256xf32>
    %cst_20 = arith.constant 1.000000e+00 : f32
    %44 = vector.broadcast %cst_20 : f32 to vector<16x256xf32>
    %45 = arith.addf %44, %43 : vector<16x256xf32>
    %46 = arith.mulf %7, %45 : vector<16x256xf32>
    %c0_21 = arith.constant 0 : index
    %c0_22 = arith.constant 0 : index
    %47 = vector.load %arg4[%c0_21, %c0_22] : memref<256x128xf32, #tpu.memory_space<vmem>>, vector<256x128xf32>
    %cst_23 = arith.constant dense<0.000000e+00> : vector<16x128xf32>
    %48 = tpu.matmul %46, %47, %cst_23 {dimension_numbers = #tpu.dot_dimension_numbers<[1], [0], [0], [1], [0, 0, 1, 1], [], []>} : vector<16x256xf32>, vector<256x128xf32>, vector<16x128xf32> -> vector<16x128xf32>
    %c0_24 = arith.constant 0 : index
    %c0_25 = arith.constant 0 : index
    %49 = vector.load %arg5[%c0_24, %c0_25] : memref<1x128xf32, #tpu.memory_space<vmem>>, vector<1x128xf32>
    %50 = vector.broadcast %49 : vector<1x128xf32> to vector<16x128xf32>
    %51 = arith.addf %48, %50 : vector<16x128xf32>
    %c0_26 = arith.constant 0 : index
    %c0_27 = arith.constant 0 : index
    %52 = vector.load %arg6[%c0_26, %c0_27] : memref<16x128xf32, #tpu.memory_space<vmem>>, vector<16x128xf32>
    tpu.vector_store %arg6[%c0_26, %c0_27], %51 {strides = array<i32>} : memref<16x128xf32, #tpu.memory_space<vmem>>, vector<16x128xf32>,
    return
  }
  func.func @transform_0(%arg0: i32) -> (i32, i32) {
    %c0_i32 = arith.constant 0 : i32
    %c0_i32_0 = arith.constant 0 : i32
    return %arg0, %c0_i32 : i32, i32
  }
  func.func @transform_1(%arg0: i32) -> (i32, i32) {
    %c0_i32 = arith.constant 0 : i32
    %c0_i32_0 = arith.constant 0 : i32
    %c0_i32_1 = arith.constant 0 : i32
    return %c0_i32, %c0_i32_0 : i32, i32
  }
  func.func @transform_2(%arg0: i32) -> (i32, i32) {
    %c0_i32 = arith.constant 0 : i32
    %c0_i32_0 = arith.constant 0 : i32
    %c0_i32_1 = arith.constant 0 : i32
    return %c0_i32, %c0_i32_0 : i32, i32
  }
  func.func @transform_3(%arg0: i32) -> (i32, i32) {
    %c0_i32 = arith.constant 0 : i32
    %c0_i32_0 = arith.constant 0 : i32
    %c0_i32_1 = arith.constant 0 : i32
    return %c0_i32, %c0_i32_0 : i32, i32
  }
  func.func @transform_4(%arg0: i32) -> (i32, i32) {
    %c0_i32 = arith.constant 0 : i32
    %c0_i32_0 = arith.constant 0 : i32
    %c0_i32_1 = arith.constant 0 : i32
    return %c0_i32, %c0_i32_0 : i32, i32
  }
  func.func @transform_5(%arg0: i32) -> (i32, i32) {
    %c0_i32 = arith.constant 0 : i32
    %c0_i32_0 = arith.constant 0 : i32
    return %arg0, %c0_i32 : i32, i32
  }
}

</mosaic_0001>

<bundles_post_ra>
// kernel: tpu_custom_call.1
= control target key start
LH: loop header
LB: loop body
LE: loop exit
PB: predicated region body
PF: predicated region fallthrough
CT: control target
= control target key end

     0   :  { %10 = vsyncpa [#allocation3], 0  ;;  %s736_s0 = inlined_call_operand.hbm [shape: f32[16,128], index: 0, kind: input, shape index: {}]   ;;  %s737_s1 = inlined_call_operand.hbm [shape: f32[128,256], index: 1, kind: input, shape index: {}]   ;;  %s738_s2 = inlined_call_operand.hbm [shape: f32[1,256], index: 2, kind: input, shape index: {}]   ;;  %s739_s3 = inlined_call_operand.hbm [shape: f32[256,128], index: 3, kind: input, shape index: {}]   ;;  %s740_s4 = inlined_call_operand.vmem [shape: f32[1,128], index: 4, kind: input, shape index: {}]   ;;  %s741_s5 = inlined_call_operand.hbm [shape: f32[16,128], index: 5, kind: output, shape index: {}]  }
   0x1   :  { %11 = vsyncpa [#allocation6], 0 }
   0x2   :  { %12 = vsyncpa [#allocation9], 0  ;;  %s31_s20 = sshll.u32 %s737_s1, 4  ;;  %s32_s20 = int_to_ptr.hbm [resolvable:$true] %s31_s20 }
   0x3   :  { %13 = vsyncpa [#allocation4], 0  ;;  %s588_s21 = smov [#allocation5]   ;;  %s18_s25 = sshll.u32 %s736_s0, 4  ;;  %s19_s25 = int_to_ptr.hbm [resolvable:$true] %s18_s25 }
   0x4   :  { %s33_s22 = sshll.u32 %s588_s21, 4  ;;  %s589_s26 = smov 256   ;;  %s34_s22 = int_to_ptr.vmem [resolvable:$true] %s33_s22 }
   0x5   :  { %s590_s27 = smov 16   ;;  %s591_s28 = smov [#allocation2]  }
   0x6   :  { %39 = dma.hbm_to_vmem [thread:$0]  %s32_s20, 4096, %s34_s22, [#allocation6], %s589_s26, %s589_s26, %s590_s27  }
   0x7   :  { %s20_s29 = sshll.u32 %s591_s28, 4  ;;  %s592_s30 = smov 128   ;;  %s21_s29 = int_to_ptr.vmem [resolvable:$true] %s20_s29 }
   0x8   :  { %s593_s6 = smov 8   ;;  %s45_s8 = sshll.u32 %s738_s2, 4  ;;  %s46_s8 = int_to_ptr.hbm [resolvable:$true] %s45_s8 }
   0x9   :  { %26 = dma.hbm_to_vmem [thread:$0]  %s19_s25, 256, %s21_s29, [#allocation3], %s592_s30, %s592_s30, %s593_s6  }
   0xa   :  { %s594_s9 = smov [#allocation7]   ;;  %s55_s12 = sshll.u32 %s739_s3, 4  ;;  %s56_s12 = int_to_ptr.hbm [resolvable:$true] %s55_s12 }
   0xb   :  { %s47_s0 = sshll.u32 %s594_s9, 4  ;;  %s595_s13 = smov [#allocation8]   ;;  %s48_s0 = int_to_ptr.vmem [resolvable:$true] %s47_s0 }
   0xc   :  { %50 = dma.hbm_to_vmem [thread:$0]  %s46_s8, 32, %s48_s0, [#allocation6]  }
   0xd   :  { %s57_s14 = sshll.u32 %s595_s13, 4  ;;  %s58_s14 = int_to_ptr.vmem [resolvable:$true] %s57_s14 }
   0xe   :  { %63 = dma.hbm_to_vmem [thread:$0]  %s56_s12, 4096, %s58_s14, [#allocation9], %s592_s30, %s592_s30, %s593_s6  }
   0xf   :  { %580 = dma.done.wait [#allocation3], 256  }
  0x10   :  { %581 = vsyncadd [#allocation3], 4294967040 }
  0x11   :  { %582 = dma.done.wait [#allocation6], 4128  }
  0x12   :  { %583 = vsyncadd [#allocation6], 4294963168 }
  0x13   :  { %584 = dma.done.wait [#allocation9], 4096  }
  0x14   :  { %585 = vsyncadd [#allocation9], 4294963200  ;;  %v114_v0 = vld [vmem:[#allocation5 + $0xf0] sm:$0xff]  ;;  %v115_v1 = vld [vmem:[#allocation5 + $0xf8] sm:$0xff]  ;;  %s597_s15 = smov [#allocation10]   ;;  %s418_s19 = sshll.u32 %s741_s5, 4  ;;  %s419_s19 = int_to_ptr.hbm [resolvable:$true] %s418_s19 }
  0x15   :  { %v112_v2 = vld [vmem:[#allocation5 + $0xe0] sm:$0xff]  ;;  %122 = vmatpush.msra.mxu0 %v114_v0  ;;  %145 = vmatpush.msra.mxu1 %v115_v1  ;;  %v113_v3 = vld [vmem:[#allocation5 + $0xe8] sm:$0xff]  ;;  %v110_v4 = vld [vmem:[#allocation5 + $0xd0] sm:$0xff]  ;;  %s416_s16 = sshll.u32 %s597_s15, 4  ;;  %s417_s16 = int_to_ptr.vmem [resolvable:$true] %s416_s16 }
  0x16   :  { %v111_v5 = vld [vmem:[#allocation5 + $0xd8] sm:$0xff]  ;;  %v108_v6 = vld [vmem:[#allocation5 + $0xc0] sm:$0xff]  ;;  %v109_v7 = vld [vmem:[#allocation5 + $0xc8] sm:$0xff] }
  0x17   :  { %123 = vmatpush.msra.mxu0 %v112_v2  ;;  %146 = vmatpush.msra.mxu1 %v113_v3  ;;  %v106_v8 = vld [vmem:[#allocation5 + $0xb0] sm:$0xff]  ;;  %v107_v9 = vld [vmem:[#allocation5 + $0xb8] sm:$0xff]  ;;  %v104_v10 = vld [vmem:[#allocation5 + $0xa0] sm:$0xff] }
  0x18   :  { %v105_v11 = vld [vmem:[#allocation5 + $0xa8] sm:$0xff]  ;;  %v102_v12 = vld [vmem:[#allocation5 + $0x90] sm:$0xff]  ;;  %v103_v13 = vld [vmem:[#allocation5 + $0x98] sm:$0xff] }
  0x19   :  { %124 = vmatpush.msra.mxu0 %v110_v4  ;;  %147 = vmatpush.msra.mxu1 %v111_v5  ;;  %v100_v14 = vld [vmem:[#allocation5 + $0x80] sm:$0xff]  ;;  %v101_v15 = vld [vmem:[#allocation5 + $0x88] sm:$0xff]  ;;  %v98_v16 = vld [vmem:[#allocation5 + $0x70] sm:$0xff] }
  0x1a   :  { %v99_v17 = vld [vmem:[#allocation5 + $0x78] sm:$0xff]  ;;  %v96_v18 = vld [vmem:[#allocation5 + $0x60] sm:$0xff]  ;;  %v97_v19 = vld [vmem:[#allocation5 + $0x68] sm:$0xff] }
  0x1b   :  { %125 = vmatpush.msra.mxu0 %v108_v6  ;;  %148 = vmatpush.msra.mxu1 %v109_v7  ;;  %v94_v20 = vld [vmem:[#allocation5 + $0x50] sm:$0xff]  ;;  %v95_v21 = vld [vmem:[#allocation5 + $0x58] sm:$0xff]  ;;  %v92_v22 = vld [vmem:[#allocation5 + $0x40] sm:$0xff] }
  0x1c   :  { %v93_v23 = vld [vmem:[#allocation5 + $0x48] sm:$0xff]  ;;  %v90_v24 = vld [vmem:[#allocation5 + $0x30] sm:$0xff]  ;;  %v91_v25 = vld [vmem:[#allocation5 + $0x38] sm:$0xff] }
  0x1d   :  { %126 = vmatpush.msra.mxu0 %v106_v8  ;;  %149 = vmatpush.msra.mxu1 %v107_v9  ;;  %v88_v26 = vld [vmem:[#allocation5 + $0x20] sm:$0xff]  ;;  %v89_v27 = vld [vmem:[#allocation5 + $0x28] sm:$0xff]  ;;  %v86_v28 = vld [vmem:[#allocation5 + $0x10] sm:$0xff] }
  0x1e   :  { %v87_v29 = vld [vmem:[#allocation5 + $0x18] sm:$0xff]  ;;  %v84_v30 = vld [vmem:[#allocation5] sm:$0xff]  ;;  %v85_v31 = vld [vmem:[#allocation5 + $0x8] sm:$0xff] }
  0x1f   :  { %127 = vmatpush.msra.mxu0 %v104_v10  ;;  %150 = vmatpush.msra.mxu1 %v105_v11  ;;  %v82_v32 = vld [vmem:[#allocation2] sm:$0xff]  ;;  %v83_v33 = vld [vmem:[#allocation2 + $0x8] sm:$0xff]  ;;  %v116_v34 = vld [vmem:[#allocation7] sm:$0x3] }
  0x20   :  { %v343_v35 = vld [vmem:[#allocation8 + $0x78] sm:$0xff]  ;;  %v342_v37 = vld [vmem:[#allocation8 + $0x70] sm:$0xff]  ;;  %v118_v39 = vperm.slane %v116_v34, 0  ;;  %v119_v40 = vperm.slane %v116_v34, 1  ;;  %v341_v41 = vld [vmem:[#allocation8 + $0x68] sm:$0xff] }
  0x21   :  { %128 = vmatpush.msra.mxu0 %v102_v12  ;;  %151 = vmatpush.msra.mxu1 %v103_v13  ;;  %v359_v36 = vld [vmem:[#allocation8 + $0xf8] sm:$0xff]  ;;  %v358_v38 = vld [vmem:[#allocation8 + $0xf0] sm:$0xff]  ;;  %v357_v42 = vld [vmem:[#allocation8 + $0xe8] sm:$0xff] }
  0x22   :  { %364 = vmatpush.msra.mxu2 %v343_v35  ;;  %387 = vmatpush.msra.mxu3 %v359_v36  ;;  %v340_v43 = vld [vmem:[#allocation8 + $0x60] sm:$0xff]  ;;  %v339_v47 = vld [vmem:[#allocation8 + $0x58] sm:$0xff]  ;;  %v338_v51 = vld [vmem:[#allocation8 + $0x50] sm:$0xff] }
  0x23   :  { %129 = vmatpush.msra.mxu0 %v100_v14  ;;  %152 = vmatpush.msra.mxu1 %v101_v15  ;;  %v356_v44 = vld [vmem:[#allocation8 + $0xe0] sm:$0xff]  ;;  %v355_v48 = vld [vmem:[#allocation8 + $0xd8] sm:$0xff]  ;;  %v354_v52 = vld [vmem:[#allocation8 + $0xd0] sm:$0xff] }
  0x24   :  { %365 = vmatpush.msra.mxu2 %v342_v37  ;;  %388 = vmatpush.msra.mxu3 %v358_v38  ;;  %v337_v55 = vld [vmem:[#allocation8 + $0x48] sm:$0xff]  ;;  %v336_v59 = vld [vmem:[#allocation8 + $0x40] sm:$0xff]  ;;  %v335_v1 = vld [vmem:[#allocation8 + $0x38] sm:$0xff] }
  0x25   :  { %130 = vmatpush.msra.mxu0 %v98_v16  ;;  %153 = vmatpush.msra.mxu1 %v99_v17  ;;  %v353_v56 = vld [vmem:[#allocation8 + $0xc8] sm:$0xff]  ;;  %v352_v60 = vld [vmem:[#allocation8 + $0xc0] sm:$0xff]  ;;  %v351_v2 = vld [vmem:[#allocation8 + $0xb8] sm:$0xff] }
  0x26   :  { %366 = vmatpush.msra.mxu2 %v341_v41  ;;  %389 = vmatpush.msra.mxu3 %v357_v42  ;;  %v334_v7 = vld [vmem:[#allocation8 + $0x30] sm:$0xff]  ;;  %v333_v10 = vld [vmem:[#allocation8 + $0x28] sm:$0xff]  ;;  %v332_v14 = vld [vmem:[#allocation8 + $0x20] sm:$0xff] }
  0x27   :  { %131 = vmatpush.msra.mxu0 %v96_v18  ;;  %154 = vmatpush.msra.mxu1 %v97_v19  ;;  %v350_v8 = vld [vmem:[#allocation8 + $0xb0] sm:$0xff]  ;;  %v349_v11 = vld [vmem:[#allocation8 + $0xa8] sm:$0xff]  ;;  %v348_v15 = vld [vmem:[#allocation8 + $0xa0] sm:$0xff] }
  0x28   :  { %367 = vmatpush.msra.mxu2 %v340_v43  ;;  %390 = vmatpush.msra.mxu3 %v356_v44  ;;  %v331_v18 = vld [vmem:[#allocation8 + $0x18] sm:$0xff]  ;;  %v328_v36 = vld [vmem:[#allocation8] sm:$0xff] }
  0x29   :  { %132 = vmatpush.msra.mxu0 %v94_v20  ;;  %155 = vmatpush.msra.mxu1 %v95_v21  ;;  %v347_v19 = vld [vmem:[#allocation8 + $0x98] sm:$0xff]  ;;  %v344_v37 = vld [vmem:[#allocation8 + $0x80] sm:$0xff] }
  0x2a   :  { %368 = vmatpush.msra.mxu2 %v339_v47  ;;  %391 = vmatpush.msra.mxu3 %v355_v48 }
  0x2b   :  { %133 = vmatpush.msra.mxu0 %v92_v22  ;;  %156 = vmatpush.msra.mxu1 %v93_v23 }
  0x2c   :  { %369 = vmatpush.msra.mxu2 %v338_v51  ;;  %392 = vmatpush.msra.mxu3 %v354_v52 }
  0x2d   :  { %134 = vmatpush.msra.mxu0 %v90_v24  ;;  %157 = vmatpush.msra.mxu1 %v91_v25  ;;  %v330_v25 = vld [vmem:[#allocation8 + $0x10] sm:$0xff] }
  0x2e   :  { %370 = vmatpush.msra.mxu2 %v337_v55  ;;  %393 = vmatpush.msra.mxu3 %v353_v56 }
  0x2f   :  { %135 = vmatpush.msra.mxu0 %v88_v26  ;;  %158 = vmatpush.msra.mxu1 %v89_v27  ;;  %v346_v26 = vld [vmem:[#allocation8 + $0x90] sm:$0xff] }
  0x30   :  { %371 = vmatpush.msra.mxu2 %v336_v59  ;;  %394 = vmatpush.msra.mxu3 %v352_v60 }
  0x31   :  { %136 = vmatpush.msra.mxu0 %v86_v28  ;;  %159 = vmatpush.msra.mxu1 %v87_v29 }
  0x32   :  { %372 = vmatpush.msra.mxu2 %v335_v1  ;;  %395 = vmatpush.msra.mxu3 %v351_v2 }
  0x33   :  { %137 = vmatpush.msra.mxu0 %v84_v30  ;;  %160 = vmatpush.msra.mxu1 %v85_v31  ;;  %v329_v31 = vld [vmem:[#allocation8 + $0x8] sm:$0xff] }
  0x34   :  { %138 = vmatmul.f32.vlgmr.msra.gmra.mxu0 %v82_v32  ;;  %161 = vmatmul.f32.vlgmr.msra.gmra.mxu1 %v82_v32  ;;  %v345_v32 = vld [vmem:[#allocation8 + $0x88] sm:$0xff] }
  0x35   :  { %373 = vmatpush.msra.mxu2 %v334_v7  ;;  %396 = vmatpush.msra.mxu3 %v350_v8 }
  0x37   :  { %374 = vmatpush.msra.mxu2 %v333_v10  ;;  %397 = vmatpush.msra.mxu3 %v349_v11 }
  0x39   :  { %375 = vmatpush.msra.mxu2 %v332_v14  ;;  %398 = vmatpush.msra.mxu3 %v348_v15 }
  0x3b   :  { %376 = vmatpush.msra.mxu2 %v331_v18  ;;  %399 = vmatpush.msra.mxu3 %v347_v19 }
  0x3c   :  { %141 = vmatmul.f32.gmra.mxu0 %v83_v33  ;;  %164 = vmatmul.f32.gmra.mxu1 %v83_v33 }
  0x3d   :  { %377 = vmatpush.msra.mxu2 %v330_v25  ;;  %400 = vmatpush.msra.mxu3 %v346_v26 }
  0x3f   :  { %378 = vmatpush.msra.mxu2 %v329_v31  ;;  %401 = vmatpush.msra.mxu3 %v345_v32 }
  0x41   :  { %379 = vmatpush.msra.mxu2 %v328_v36  ;;  %402 = vmatpush.msra.mxu3 %v344_v37 }
  0xb1   :  { %v139_v45 = vpop.f32.mrf.mxu0  ;;  %v162_v46 = vpop.f32.mrf.mxu1 }
  0xb2   :  { %v646_v49 = vadd.f32 %v139_v45, %v118_v39  ;;  %v648_v50 = vadd.f32 %v162_v46, %v119_v40 }
  0xb4   :  { %v651_v53 = vmul.f32 0.70710677, %v646_v49  ;;  %v654_v54 = vmul.f32 0.70710677, %v648_v50 }
  0xb6   :  { %v657_v57 = vand.u32 2147483647, %v651_v53  ;;  %v660_v58 = vand.u32 2147483647, %v654_v54 }
  0xb8   :  { %v188_v61 = vmul.f32 0.3275911, %v657_v57  ;;  %v189_v62 = vmul.f32 0.3275911, %v660_v58  ;;  %v292_v30 = vsub.f32 0.0, %v657_v57  ;;  %v293_v34 = vsub.f32 0.0, %v660_v58 }
  0xb9   :  { %v142_v63 = vpop.f32.mrf.mxu0  ;;  %v165_v0 = vpop.f32.mrf.mxu1 }
  0xba   :  { %v664_v3 = vadd.f32 1.0, %v188_v61  ;;  %v666_v4 = vadd.f32 1.0, %v189_v62  ;;  %v668_v5 = vadd.f32 %v142_v63, %v118_v39  ;;  %v670_v6 = vadd.f32 %v165_v0, %v119_v40 }
  0xbb   :  { %v296_v43 = vmul.f32 %v292_v30, %v657_v57  ;;  %v297_v45 = vmul.f32 %v293_v34, %v660_v58 }
  0xbc   :  { %444 = vrcp.f32 %v664_v3  ;;  %v675_v9 = vmul.f32 0.70710677, %v668_v5  ;;  %v678_v12 = vmul.f32 0.70710677, %v670_v6  ;;  %v207_v35 = vand.u32 2147483648, %v664_v3 }
  0xbd   :  { %446 = vrcp.f32 %v666_v4  ;;  %v205_v39 = vand.u32 2147483647, %v664_v3  ;;  %v222_v40 = vand.u32 2147483648, %v666_v4  ;;  %v220_v42 = vand.u32 2147483647, %v666_v4 }
  0xbe   :  { %v681_v13 = vand.u32 2147483647, %v675_v9  ;;  %v684_v16 = vand.u32 2147483647, %v678_v12  ;;  %vm201_vm2 = vweird.f32 %v664_v3  ;;  %v208_v46 = vor.u32 1.1754944e-38, %v207_v35 }
  0xbf   :  { %vm216_vm4 = vweird.f32 %v666_v4  ;;  %vm206_vm5 = vcmp.eq.f32.partialorder %v205_v39, 8.507059e+37  ;;  %v223_v52 = vor.u32 1.1754944e-38, %v222_v40  ;;  %vm221_vm7 = vcmp.eq.f32.partialorder %v220_v42, 8.507059e+37 }
  0xc0   :  { %v190_v17 = vmul.f32 0.3275911, %v681_v13  ;;  %v191_v21 = vmul.f32 0.3275911, %v684_v16  ;;  %v300_v58 = vmul.f32 1.442695, %v296_v43 }
  0xc1   :  { %v302_v63 = vmul.f32 1.442695, %v297_v45  ;;  %v294_v18 = vsub.f32 0.0, %v681_v13  ;;  %v295_v32 = vsub.f32 0.0, %v684_v16 }
  0xc2   :  { %v445_v20 = vpop.eup %444  ;;  %v689_v24 = vadd.f32 1.0, %v190_v17  ;;  %v692_v28 = vadd.f32 1.0, %v191_v21 }
  0xc3   :  { %v447_v22 = vpop.eup %446  ;;  %v197_v23 = vmul.f32 %v445_v20, %v664_v3  ;;  %vm202_vm0 = vweird.f32 %v445_v20 }
  0xc4   :  { %v212_v27 = vmul.f32 %v447_v22, %v666_v4  ;;  %448 = vrcp.f32 %v689_v24  ;;  %vm217_vm1 = vweird.f32 %v447_v22  ;;  %vm203_vm3 = vmor %vm201_vm2, %vm202_vm0  ;;  %v235_v4 = vand.u32 2147483647, %v689_v24 }
  0xc5   :  { %v198_v29 = vsub.f32 1.0, %v197_v23  ;;  %450 = vrcp.f32 %v692_v28  ;;  %vm218_vm6 = vmor %vm216_vm4, %vm217_vm1  ;;  %v237_v7 = vand.u32 2147483648, %v689_v24  ;;  %v252_v11 = vand.u32 2147483648, %v692_v28 }
  0xc6   :  { %v213_v33 = vsub.f32 1.0, %v212_v27  ;;  %v250_v17 = vand.u32 2147483647, %v692_v28  ;;  %vm231_vm10 = vweird.f32 %v689_v24  ;;  %vm246_vm12 = vweird.f32 %v692_v28 }
  0xc7   :  { %v199_v38 = vmul.f32 %v445_v20, %v198_v29  ;;  %vm236_vm13 = vcmp.eq.f32.partialorder %v235_v4, 8.507059e+37  ;;  %v253_v27 = vor.u32 1.1754944e-38, %v252_v11  ;;  %452 = vpow2.f32 %v300_v58 }
  0xc8   :  { %v214_v41 = vmul.f32 %v447_v22, %v213_v33  ;;  %vm251_vm15 = vcmp.eq.f32.partialorder %v250_v17, 8.507059e+37  ;;  %454 = vpow2.f32 %v302_v63  ;;  %vm176_vm0 = vcmp.ge.f32.partialorder %v651_v53, 0.0 }
  0xc9   :  { %v200_v44 = vadd.f32 %v445_v20, %v199_v38  ;;  %vm177_vm1 = vcmp.ge.f32.partialorder %v654_v54, 0.0  ;;  %v168_v53 = vmul.f32 0.5, %v646_v49  ;;  %v169_v54 = vmul.f32 0.5, %v648_v50 }
  0xca   :  { %v215_v47 = vadd.f32 %v447_v22, %v214_v41  ;;  %v449_v48 = vpop.eup %448  ;;  %v299_v41 = vmul.f32 %v295_v32, %v684_v16  ;;  %vm178_vm2 = vcmp.ge.f32.partialorder %v675_v9, 0.0 }
  0xcb   :  { %v204_v51 = vsel %vm203_vm3, %v445_v20, %v200_v44  ;;  %v451_v55 = vpop.eup %450  ;;  %v227_v56 = vmul.f32 %v449_v48, %v689_v24  ;;  %vm232_vm8 = vweird.f32 %v449_v48  ;;  %vm179_vm3 = vcmp.ge.f32.partialorder %v678_v12, 0.0  ;;  %v443_v12 = vld [vmem:[%s740_s4] ss:$0 sm:$0xff] }
  0xcc   :  { %v209_v57 = vsel %vm206_vm5, %v208_v46, %v204_v51  ;;  %v219_v59 = vsel %vm218_vm6, %v447_v22, %v215_v47  ;;  %v242_v60 = vmul.f32 %v451_v55, %v692_v28  ;;  %vm247_vm9 = vweird.f32 %v451_v55  ;;  %vm233_vm11 = vmor %vm231_vm10, %vm232_vm8 }
  0xcd   :  { %v256_v61 = vmul.f32 1.0614054, %v209_v57  ;;  %v224_v62 = vsel %vm221_vm7, %v223_v52, %v219_v59  ;;  %v228_v0 = vsub.f32 1.0, %v227_v56  ;;  %v238_v22 = vor.u32 1.1754944e-38, %v237_v7  ;;  %vm248_vm14 = vmor %vm246_vm12, %vm247_vm9 }
  0xce   :  { %v257_v1 = vmul.f32 1.0614054, %v224_v62  ;;  %v243_v2 = vsub.f32 1.0, %v242_v60  ;;  %v298_v28 = vmul.f32 %v294_v18, %v681_v13  ;;  %v306_v56 = vmul.f32 1.442695, %v299_v41 }
  0xcf   :  { %v260_v3 = vadd.f32 -1.4531521, %v256_v61  ;;  %v229_v10 = vmul.f32 %v449_v48, %v228_v0 }
  0xd0   :  { %v261_v8 = vadd.f32 -1.4531521, %v257_v1  ;;  %v244_v15 = vmul.f32 %v451_v55, %v243_v2  ;;  %v596_v2 = vmov -1.0  }
  0xd1   :  { %v264_v14 = vmul.f32 %v260_v3, %v209_v57  ;;  %v230_v20 = vadd.f32 %v449_v48, %v229_v10  ;;  %v183_v50 = vsel %vm179_vm3, 1.0, %v596_v2 }
  0xd2   :  { %v265_v19 = vmul.f32 %v261_v8, %v224_v62  ;;  %v245_v23 = vadd.f32 %v451_v55, %v244_v15 }
  0xd3   :  { %v268_v21 = vadd.f32 1.4214138, %v264_v14  ;;  %v234_v26 = vsel %vm233_vm11, %v449_v48, %v230_v20  ;;  %v304_v48 = vmul.f32 1.442695, %v298_v28 }
  0xd4   :  { %v269_v25 = vadd.f32 1.4214138, %v265_v19  ;;  %v239_v30 = vsel %vm236_vm13, %v238_v22, %v234_v26  ;;  %v249_v31 = vsel %vm248_vm14, %v451_v55, %v245_v23  ;;  %v453_v55 = vpop.eup %452 }
  0xd5   :  { %v272_v29 = vmul.f32 %v268_v21, %v209_v57  ;;  %v258_v34 = vmul.f32 1.0614054, %v239_v30  ;;  %v254_v24 = vsel %vm251_vm15, %v253_v27, %v249_v31  ;;  %v455_v60 = vpop.eup %454  ;;  %456 = vpow2.f32 %v304_v48 }
  0xd6   :  { %v273_v33 = vmul.f32 %v269_v25, %v224_v62  ;;  %v259_v36 = vmul.f32 1.0614054, %v254_v24  ;;  %458 = vpow2.f32 %v306_v56  ;;  %v182_v27 = vsel %vm178_vm2, 1.0, %v596_v2 }
  0xd7   :  { %v276_v35 = vadd.f32 -0.28449672, %v272_v29  ;;  %v262_v38 = vadd.f32 -1.4531521, %v258_v34  ;;  %v171_v34 = vmul.f32 0.5, %v670_v6 }
  0xd8   :  { %v277_v37 = vadd.f32 -0.28449672, %v273_v33  ;;  %v263_v40 = vadd.f32 -1.4531521, %v259_v36 }
  0xd9   :  { %v280_v39 = vmul.f32 %v276_v35, %v209_v57  ;;  %v266_v43 = vmul.f32 %v262_v38, %v239_v30 }
  0xda   :  { %v281_v42 = vmul.f32 %v277_v37, %v224_v62  ;;  %v267_v45 = vmul.f32 %v263_v40, %v254_v24 }
  0xdb   :  { %v284_v44 = vadd.f32 0.2548296, %v280_v39  ;;  %v270_v47 = vadd.f32 1.4214138, %v266_v43  ;;  %v457_v19 = vpop.eup %456 }
  0xdc   :  { %v285_v46 = vadd.f32 0.2548296, %v281_v42  ;;  %v271_v52 = vadd.f32 1.4214138, %v267_v45  ;;  %v459_v22 = vpop.eup %458 }
  0xdd   :  { %v288_v51 = vmul.f32 %v284_v44, %v209_v57  ;;  %v274_v58 = vmul.f32 %v270_v47, %v239_v30  ;;  %v180_v57 = vsel %vm176_vm0, 1.0, %v596_v2 }
  0xde   :  { %v289_v59 = vmul.f32 %v285_v46, %v224_v62  ;;  %v275_v61 = vmul.f32 %v271_v52, %v254_v24  ;;  %v181_v62 = vsel %vm177_vm1, 1.0, %v596_v2 }
  0xdf   :  { %v308_v13 = vmul.f32 %v453_v55, %v288_v51  ;;  %v278_v63 = vadd.f32 -0.28449672, %v274_v58 }
  0xe0   :  { %v309_v16 = vmul.f32 %v455_v60, %v289_v59  ;;  %v279_v1 = vadd.f32 -0.28449672, %v275_v61 }
  0xe1   :  { %v312_v0 = vsub.f32 1.0, %v308_v13  ;;  %v282_v4 = vmul.f32 %v278_v63, %v239_v30 }
  0xe2   :  { %v313_v3 = vsub.f32 1.0, %v309_v16  ;;  %v283_v8 = vmul.f32 %v279_v1, %v254_v24 }
  0xe3   :  { %v316_v7 = vmul.f32 %v312_v0, %v180_v57  ;;  %v286_v11 = vadd.f32 0.2548296, %v282_v4 }
  0xe4   :  { %v317_v10 = vmul.f32 %v313_v3, %v181_v62  ;;  %v287_v15 = vadd.f32 0.2548296, %v283_v8 }
  0xe5   :  { %v320_v14 = vadd.f32 1.0, %v316_v7  ;;  %v290_v18 = vmul.f32 %v286_v11, %v239_v30  ;;  %v170_v30 = vmul.f32 0.5, %v668_v5 }
  0xe6   :  { %v321_v17 = vadd.f32 1.0, %v317_v10  ;;  %v291_v21 = vmul.f32 %v287_v15, %v254_v24 }
  0xe7   :  { %v324_v20 = vmul.f32 %v320_v14, %v168_v53  ;;  %v310_v25 = vmul.f32 %v457_v19, %v290_v18 }
  0xe8   :  { %v325_v23 = vmul.f32 %v321_v17, %v169_v54  ;;  %v311_v26 = vmul.f32 %v459_v22, %v291_v21 }
  0xe9   :  { %380 = vmatmul.f32.vlgmr.msra.gmra.mxu2 %v324_v20  ;;  %v314_v49 = vsub.f32 1.0, %v310_v25 }
  0xea   :  { %403 = vmatmul.f32.vlgmr.msra.gmra.mxu3 %v325_v23  ;;  %v315_v29 = vsub.f32 1.0, %v311_v26 }
  0xeb   :  { %v318_v31 = vmul.f32 %v314_v49, %v182_v27 }
  0xec   :  { %v319_v32 = vmul.f32 %v315_v29, %v183_v50 }
  0xed   :  { %v322_v33 = vadd.f32 1.0, %v318_v31 }
  0xee   :  { %v323_v24 = vadd.f32 1.0, %v319_v32 }
  0xef   :  { %v326_v9 = vmul.f32 %v322_v33, %v170_v30 }
  0xf0   :  { %v327_v35 = vmul.f32 %v323_v24, %v171_v34 }
  0xf1   :  { %383 = vmatmul.f32.gmra.mxu2 %v326_v9 }
  0xf2   :  { %406 = vmatmul.f32.gmra.mxu3 %v327_v35 }
 0x16c   :  { %v381_v36 = vpop.f32.mrf.mxu2 }
 0x16d   :  { %v382_v37 = vadd.f32 %v443_v12, %v381_v36  ;;  %v404_v38 = vpop.f32.mrf.mxu3 }
 0x16f   :  { %v405_v28 = vadd.f32 %v404_v38, %v382_v37 }
 0x171   :  { %410 = vst [vmem:[#allocation10] sm:$0xff] %v405_v28 }
 0x174   :  { %v384_v39 = vpop.f32.mrf.mxu2 }
 0x175   :  { %v385_v5 = vadd.f32 %v443_v12, %v384_v39  ;;  %v407_v6 = vpop.f32.mrf.mxu3 }
 0x177   :  { %v408_v40 = vadd.f32 %v407_v6, %v385_v5 }
 0x179   :  { %411 = vst [vmem:[#allocation10 + $0x8] sm:$0xff] %v408_v40 }
 0x17a   :  { %424 = dma.vmem_to_hbm [thread:$0]  %s417_s16, 256, %s419_s19, [#allocation4], %s592_s30, %s592_s30, %s593_s6  }
 0x17b   :  { %586 = dma.done.wait [#allocation4], 256  }
 0x17c   :  { %587 = vsyncadd [#allocation4], 4294967040 }
 0x17d   :  { %429 = vsyncpa [#allocation3], 1 }
 0x17e   :  { %430 = vsyncpa [#allocation6], 1 }
 0x17f   :  { %431 = vsyncpa [#allocation9], 1 }
 0x180   :  { %432 = vsyncpa [#allocation4], 1 }

</bundles_post_ra>
